<compile_context>
chip_gen: v7x
topology: tpu7x:2x2x1
jax: 0.10.0
libtpu: 0.0.40
codegen_flags: <defaults>
</compile_context>

<pallas_src>
import jax
import jax.numpy as jnp
from jax.experimental import pallas as pl
from jax.experimental.pallas import tpu as pltpu


# ---------------------------------------------------------------------------
# Kernel bodies
# ---------------------------------------------------------------------------

def _bcast_add_kernel(x_ref, pos_ref, o_ref):
    # x_ref / o_ref: (TS, B, D); pos_ref: (TS, D)
    # Sublane-broadcast of pos over the batch axis; no replicated operand.
    o_ref[...] = x_ref[...] + pos_ref[...][:, None, :]


def _make_chunked_add_kernel(batch: int, d_model: int):
    def kernel(x_ref, pos_ref, o_ref):
        # x_ref / o_ref: (TS, B*D) lane-dense tile; pos_ref: (TS, D)
        pos = pos_ref[...]                              # (TS, D)
        for b in range(batch):                          # static unroll, B chunk adds
            sl = slice(b * d_model, (b + 1) * d_model)  # lane-aligned when D%128==0
            o_ref[:, sl] = x_ref[:, sl] + pos
    return kernel


# ---------------------------------------------------------------------------
# Tile sizing
# ---------------------------------------------------------------------------

def _choose_seq_tile(S: int, row_bytes: int, sublane: int,
                     *, target_bytes: int = 6 * 1024 * 1024,
                     min_grid_steps: int = 4) -> int:
    """Sequence tile: ~6 MiB x-tiles, sublane-aligned, >= min_grid_steps steps.

    ~6 MiB tiles keep the per-step fixed overhead (~0.35 us) under ~7% of the
    HBM stream time even at v7x's ~3.2 TB/s, while the double-buffered working
    set stays inside the explicit 48 MiB VMEM limit.  The cap keeps at least
    `min_grid_steps` grid steps so v7x's two TensorCores both get work.
    """
    ts = max(sublane, (target_bytes // max(1, row_bytes)) // sublane * sublane)
    cap = -(-S // min_grid_steps)             # ceil(S / min_grid_steps)
    cap = -(-cap // sublane) * sublane        # round up to sublane multiple
    ts = max(sublane, min(ts, cap))
    if ts >= S:
        return S                              # full extent: always a legal block dim
    return ts


# ---------------------------------------------------------------------------
# Wrapper
# ---------------------------------------------------------------------------

def learned_positional_encoding(x, pos_table, *, seq_tile=None, in_place=False,
                                vmem_limit_bytes=48 << 20):
    """x: (S, B, D), pos_table: (max_len, D) -> (S, B, D).

    Set in_place=True (and donate x at your jit boundary) to alias the output
    onto x's buffer; left off by default so callers keep x alive.
    """
    S, B, D = x.shape
    max_len, Dt = pos_table.shape
    assert Dt == D and S <= max_len

    itemsize = jnp.dtype(x.dtype).itemsize
    sublane = max(8, 32 // itemsize)          # 8 f32 / 16 bf16 / 32 int8-fp8

    row_bytes = B * D * itemsize
    TS = seq_tile if seq_tile is not None else _choose_seq_tile(S, row_bytes, sublane)
    grid = (pl.cdiv(S, TS),)

    cost = pl.CostEstimate(
        flops=S * B * D,
        transcendentals=0,
        bytes_accessed=(2 * S * B * D + S * D) * itemsize,
    )
    cparams = pltpu.CompilerParams(
        # Pure elementwise stream, every grid step independent -> parallel
        # (lets v7x shard the mem-bound stream across both TensorCores).
        dimension_semantics=("parallel",),
        vmem_limit_bytes=vmem_limit_bytes,
    )
    aliases = {0: 0} if in_place else {}

    use_3d = (D % 128 == 0) and (B % sublane == 0)

    if use_3d:
        # Lane axis = D (128-multiple -> unmasked full-width stores); sublane
        # axis = B (multiple of the packing count -> no padded sublanes).
        return pl.pallas_call(
            _bcast_add_kernel,
            out_shape=jax.ShapeDtypeStruct((S, B, D), x.dtype),
            grid_spec=pltpu.PrefetchScalarGridSpec(
                num_scalar_prefetch=0,
                grid=grid,
                in_specs=[
                    pl.BlockSpec((TS, B, D), lambda i: (i, 0, 0)),
                    # pos rows DMA'd straight from the full table, same row window.
                    pl.BlockSpec((TS, D), lambda i: (i, 0)),
                ],
                out_specs=pl.BlockSpec((TS, B, D), lambda i: (i, 0, 0)),
            ),
            compiler_params=cparams,
            cost_estimate=cost,
            input_output_aliases=aliases,
        )(x, pos_table)

    # Fallback: lane-dense (S, B*D) presentation, chunked add over batch.
    x2d = x.reshape(S, B * D)
    out2d = pl.pallas_call(
        _make_chunked_add_kernel(B, D),
        out_shape=jax.ShapeDtypeStruct((S, B * D), x.dtype),
        grid_spec=pltpu.PrefetchScalarGridSpec(
            num_scalar_prefetch=0,
            grid=grid,
            in_specs=[
                pl.BlockSpec((TS, B * D), lambda i: (i, 0)),
                pl.BlockSpec((TS, D), lambda i: (i, 0)),
            ],
            out_specs=pl.BlockSpec((TS, B * D), lambda i: (i, 0)),
        ),
        compiler_params=cparams,
        cost_estimate=cost,
        input_output_aliases=aliases,
    )(x2d, pos_table)
    return out2d.reshape(S, B, D)


# ---------------------------------------------------------------------------
# Self-test
# ---------------------------------------------------------------------------

if __name__ == "__main__":
    key = jax.random.PRNGKey(0)
    k_x, k_emb, k_x2, k_emb2 = jax.random.split(key, 4)
    max_len = 512

    # 1) Toy shapes matching the module defaults (d_model=32) -> exercises the
    #    2-D chunked path (D is not a 128-multiple).
    d_model, seq_len, batch = 32, 8, 2
    pos_table = jax.random.normal(k_emb, (max_len, d_model), dtype=jnp.float32)
    x = jax.random.normal(k_x, (seq_len, batch, d_model), dtype=jnp.float32)

    out = jax.block_until_ready(learned_positional_encoding(x, pos_table))
    ref = x + pos_table[:seq_len][:, None, :]
    assert out.shape == (seq_len, batch, d_model)
    assert jnp.allclose(out, ref, atol=1e-6, rtol=1e-6)

    # 2) Lane-dense / ragged check: D a 128-multiple, B a sublane multiple,
    #    S not a multiple of the auto-chosen tile -> exercises the 3-D
    #    broadcast path and a partial last block.
    d2, s2, b2 = 128, 40, 8
    pos_table2 = jax.random.normal(k_emb2, (max_len, d2), dtype=jnp.float32)
    x2 = jax.random.normal(k_x2, (s2, b2, d2), dtype=jnp.float32)

    out2 = jax.block_until_ready(learned_positional_encoding(x2, pos_table2))
    ref2 = x2 + pos_table2[:s2][:, None, :]
    assert out2.shape == (s2, b2, d2)
    assert jnp.allclose(out2, ref2, atol=1e-6, rtol=1e-6)

    print("KERNEL_OK")
</pallas_src>

<mosaic_0001>
module attributes {stable_mosaic.version = 11 : i64} {
  func.func @kernel(%arg0: i32, %arg1: memref<8x64xf32, #tpu.memory_space<vmem>>, %arg2: memref<8x32xf32, #tpu.memory_space<vmem>>, %arg3: memref<8x64xf32, #tpu.memory_space<vmem>>) attributes {dimension_semantics = [#tpu.dimension_semantics<parallel>], iteration_bounds = array<i64: 1>, scalar_prefetch = 0 : i64, scratch_operands = 0 : i64, tpu.core_type = #tpu.core_type<tc>, window_params = [{transform_indices = @transform_0, window_bounds = array<i64: 8, 64>}, {transform_indices = @transform_1, window_bounds = array<i64: 8, 32>}, {transform_indices = @transform_2, window_bounds = array<i64: 8, 64>}]} {
    %c0 = arith.constant 0 : index
    %c0_0 = arith.constant 0 : index
    %0 = vector.load %arg2[%c0, %c0_0] : memref<8x32xf32, #tpu.memory_space<vmem>>, vector<8x32xf32>
    %c0_1 = arith.constant 0 : index
    %c0_2 = arith.constant 0 : index
    %1 = vector.load %arg1[%c0_1, %c0_2] : memref<8x64xf32, #tpu.memory_space<vmem>>, vector<8x32xf32>
    %2 = arith.addf %1, %0 : vector<8x32xf32>
    %c0_3 = arith.constant 0 : index
    %c0_4 = arith.constant 0 : index
    %3 = vector.load %arg3[%c0_3, %c0_4] : memref<8x64xf32, #tpu.memory_space<vmem>>, vector<8x32xf32>
    tpu.vector_store %arg3[%c0_3, %c0_4], %2 {strides = array<i32>} : memref<8x64xf32, #tpu.memory_space<vmem>>, vector<8x32xf32>,
    %c0_5 = arith.constant 0 : index
    %c32 = arith.constant 32 : index
    %4 = vector.load %arg1[%c0_5, %c32] : memref<8x64xf32, #tpu.memory_space<vmem>>, vector<8x32xf32>
    %5 = arith.addf %4, %0 : vector<8x32xf32>
    %c0_6 = arith.constant 0 : index
    %c32_7 = arith.constant 32 : index
    %6 = vector.load %arg3[%c0_6, %c32_7] : memref<8x64xf32, #tpu.memory_space<vmem>>, vector<8x32xf32>
    tpu.vector_store %arg3[%c0_6, %c32_7], %5 {strides = array<i32>} : memref<8x64xf32, #tpu.memory_space<vmem>>, vector<8x32xf32>,
    return
  }
  func.func @transform_0(%arg0: i32) -> (i32, i32) {
    %c0_i32 = arith.constant 0 : i32
    %c0_i32_0 = arith.constant 0 : i32
    return %arg0, %c0_i32 : i32, i32
  }
  func.func @transform_1(%arg0: i32) -> (i32, i32) {
    %c0_i32 = arith.constant 0 : i32
    %c0_i32_0 = arith.constant 0 : i32
    return %arg0, %c0_i32 : i32, i32
  }
  func.func @transform_2(%arg0: i32) -> (i32, i32) {
    %c0_i32 = arith.constant 0 : i32
    %c0_i32_0 = arith.constant 0 : i32
    return %arg0, %c0_i32 : i32, i32
  }
}

</mosaic_0001>

<bundles_post_ra>
// kernel: tpu_custom_call.1
= control target key start
LH: loop header
LB: loop body
LE: loop exit
PB: predicated region body
PF: predicated region fallthrough
CT: control target
= control target key end

     0   :  { %vm15_vm0 = vcmask 261120   ;;  %s100_s0 = inlined_call_operand.vmem [shape: f32[8,64], index: 0, kind: input, shape index: {}]   ;;  %s101_s1 = inlined_call_operand.vmem [shape: f32[512,32], index: 1, kind: input, shape index: {}]   ;;  %s102_s2 = inlined_call_operand.hbm [shape: f32[8,64], index: 2, kind: output, shape index: {}]  }
   0x1   :  { %v12_v0 = vld [vmem:[%s101_s1] sm:$0xff] }
   0x2   :  { %v13_v1 = vld [vmem:[%s100_s0] sm:$0xff] }
   0x3   :  { %7 = vsyncpa [#allocation3], 0  ;;  %v14_v2 = vadd.f32 %v13_v1, %v12_v0  ;;  %s65_s13 = smov 32   ;;  %s66_s14 = smov [#allocation2]   ;;  %vm23_vm1 = vcmask 523520  }
   0x4   :  { %19 = vrot.lane.b32.xlu0 %v12_v0, %s65_s13  ;;  %s31_s15 = sshll.u32 %s66_s14, 4  ;;  %s32_s15 = int_to_ptr.vmem [resolvable:$true] %s31_s15 }
   0x5   :  { %16 = vst.msk [vmem:[#allocation2] sm:$0xff] %vm15_vm0, %v14_v2  ;;  %s41_s16 = scalar_lea.vmem %s32_s15, 128  ;;  %p46_p1 = scmp.lt.s32.totalorder %s32_s15, %s32_s15 }
   0x6   :  { %p42_p0 = scmp.ne.s32.totalorder %s32_s15, %s41_s16  ;;  %p47_p2 = scmp.lt.s32.totalorder %s41_s16, %s41_s16 }
   0x8   :  { %p48_p3 = por %p47_p2, %p46_p1 }
   0xa   :  { %p49_p4 = pnand %p48_p3, %p42_p0 }
  0x76   :  { %v20_v3 = vpop.permute.xlu0 %19 }
  0x77   :  { %v22_v4 = vadd.f32 %v20_v3, %v13_v1 }
  0x79   :  { %24 = vst.msk [vmem:[#allocation2] sm:$0xff] %vm23_vm1, %v22_v4 }
  0x7a   :  { %52 = shalt.err (!%p49_p4)
}
  0x7b   :  { %s53_s17 = scalar_lea.hbm %s102_s2, 128 }
  0x7c   :  { %p54_p5 = scmp.ne.s32.totalorder %s102_s2, %s53_s17  ;;  %p57_p6 = scmp.lt.u32.totalorder %s53_s17, %s102_s2 }
  0x7e   :  { %p59_p7 = pnand %p57_p6, %p54_p5 }
  0x80   :  { %62 = shalt.err (!%p59_p7)
}
  0x81   :  { %34 = dma.vmem_to_hbm [thread:$0]  %s32_s15, 128, %s102_s2, [#allocation3]  }
  0x82   :  { %63 = dma.done.wait [#allocation3], 128  }
  0x83   :  { %64 = vsyncadd [#allocation3], 4294967168 }
  0x84   :  { %38 = vsyncpa [#allocation3], 1 }

</bundles_post_ra>
